<compile_context>
chip_gen: v7x
topology: tpu7x:2x2x1
jax: 0.10.0
libtpu: 0.0.40
codegen_flags: <defaults>
</compile_context>

<pallas_src>
import jax
import jax.numpy as jnp
from jax.experimental import pallas as pl
from jax.experimental.pallas import tpu as pltpu

BANDS_NUM_HSI = 14


# ----------------------------------------------------------------------------
# Kernels
# ----------------------------------------------------------------------------
def _make_tiled_kernel(piece_channels, b_tile, hidden, inv_hw, hw_tile, n_hw_steps):
    """2-D grid kernel: (batch tile, spatial tile) with lane-wide accumulators."""
    n_pieces = len(piece_channels)
    n_chunks = hw_tile // 128

    def kernel(*refs):
        x_refs = refs[:n_pieces]
        w1_refs = refs[n_pieces:2 * n_pieces]
        w2_ref = refs[2 * n_pieces]
        out_ref = refs[2 * n_pieces + 1]
        acc_refs = refs[2 * n_pieces + 2:]
        hw_step = pl.program_id(1)

        # --- init lane-wide accumulators on first spatial step of a batch tile
        @pl.when(hw_step == 0)
        def _init():
            for acc in acc_refs:
                acc[...] = jnp.zeros_like(acc)

        # --- streaming phase: pure vld + (cast) + vadd, no XLU work ----------
        # NOTE: each piece is one DMA per step; ci % 8 != 0 pads sublanes and
        # wastes up to 8/ci of load bandwidth (group tiny pieces upstream).
        for x_ref, acc in zip(x_refs, acc_refs):
            for k in range(n_chunks):
                acc[...] += x_ref[:, :, k * 128:(k + 1) * 128].astype(jnp.float32)

        # --- finalize once per batch tile: reduce + mean + FC head + softmax -
        @pl.when(hw_step == n_hw_steps - 1)
        def _finalize():
            h = jnp.zeros((b_tile, hidden), dtype=jnp.float32)
            for acc, w1_ref in zip(acc_refs, w1_refs):
                y_i = jnp.sum(acc[...], axis=-1) * inv_hw          # (b_tile, ci)
                h = h + jnp.dot(y_i, w1_ref[...],
                                preferred_element_type=jnp.float32)
            h = jnp.maximum(h, 0.0)                                 # ReLU
            logits = jnp.dot(h, w2_ref[...],
                             preferred_element_type=jnp.float32)    # (b_tile, 14)
            m = jnp.max(logits, axis=-1, keepdims=True)
            e = jnp.exp(logits - m)
            s = jnp.sum(e, axis=-1, keepdims=True)
            out_ref[:, 0, :] = e / s        # exact divide -> rows sum to 1

    return kernel


def _make_single_kernel(piece_channels, b_tile, hidden, inv_hw):
    """1-D batch grid kernel: whole spatial extent in one block (no scratch)."""
    n_pieces = len(piece_channels)

    def kernel(*refs):
        x_refs = refs[:n_pieces]
        w1_refs = refs[n_pieces:2 * n_pieces]
        w2_ref = refs[2 * n_pieces]
        out_ref = refs[2 * n_pieces + 1]

        h = jnp.zeros((b_tile, hidden), dtype=jnp.float32)
        for x_ref, w1_ref in zip(x_refs, w1_refs):
            y_i = jnp.sum(x_ref[...].astype(jnp.float32), axis=-1) * inv_hw
            h = h + jnp.dot(y_i, w1_ref[...], preferred_element_type=jnp.float32)
        h = jnp.maximum(h, 0.0)
        logits = jnp.dot(h, w2_ref[...], preferred_element_type=jnp.float32)
        m = jnp.max(logits, axis=-1, keepdims=True)
        e = jnp.exp(logits - m)
        s = jnp.sum(e, axis=-1, keepdims=True)
        out_ref[:, 0, :] = e / s

    return kernel


# ----------------------------------------------------------------------------
# Generation-aware sizing helpers
# ----------------------------------------------------------------------------
def _vmem_budget():
    """(double-buffered x-stream budget, vmem_limit_bytes), derived from HW."""
    cap = None
    try:
        cap = getattr(pltpu.get_tpu_info(), "vmem_capacity_bytes", None)
    except Exception:
        cap = None
    if cap is None:
        cap = 64 * 1024 * 1024          # conservative: v7x per-TC VMEM
    if cap >= 128 * 1024 * 1024:        # v5e / v6e: 128 MiB physical VMEM
        return 40 * 1024 * 1024, 96 * 1024 * 1024
    return 24 * 1024 * 1024, 48 * 1024 * 1024   # v7x / unknown: stay under 64 MiB


def _pick_b_tile(b):
    """Largest of {8,4,2,1} dividing b that still yields >= 2 batch tiles
    (keeps both v7x TensorCores busy); falls back to b when b == 1."""
    for bt in (8, 4, 2, 1):
        if b % bt == 0 and b // bt >= 2:
            return bt
    return b


def _pick_b_tile_single(b, c_total, hw, itemsize, budget):
    """Batch tile for the single-spatial-block path: fit the double-buffered
    stream under budget, preferring >= 2 batch tiles."""
    divs = [d for d in range(b, 0, -1) if b % d == 0]
    fits = [d for d in divs if 2 * d * c_total * hw * itemsize <= budget]
    if not fits:
        # TODO(synk): for huge non-128-divisible H*W even b_tile=1 may exceed
        # the budget; proper H-row tiling of the 4-D layout would fix this.
        return 1
    multi = [d for d in fits if b // d >= 2]
    return multi[0] if multi else fits[0]


def _pick_hw_tile(hw, b_tile, c_total, itemsize, budget):
    """Largest multiple of 128 dividing hw whose double-buffered x stream fits
    the budget (capped at 4096 lanes so the unrolled chunk loop stays small)."""
    per_lane = 2 * b_tile * c_total * itemsize
    max_lanes = max(128, budget // max(per_lane, 1))
    max_lanes = min(max_lanes, 32 * 128)
    best = 128
    t = 128
    while t <= min(hw, max_lanes):
        if hw % t == 0:
            best = t
        t += 128
    return best


# ----------------------------------------------------------------------------
# Wrapper
# ----------------------------------------------------------------------------
def se_layer_hsi(x_list, w1, w2, *, b_tile=None, hw_tile=None):
    """x_list: list of (B, C_i, H, W); w1: (hidden, C_total), w2: (14, hidden)
    in PyTorch nn.Linear layout (out_features, in_features), bias=False."""
    b, _, h_dim, w_dim = x_list[0].shape
    for xi in x_list:
        assert xi.shape[0] == b and xi.shape[2] == h_dim and xi.shape[3] == w_dim
    hw = h_dim * w_dim
    piece_channels = [int(xi.shape[1]) for xi in x_list]
    c_total = sum(piece_channels)
    hidden = int(w1.shape[0])
    assert w1.shape == (hidden, c_total)
    assert w2.shape == (BANDS_NUM_HSI, hidden)

    # Free metadata reshape: flatten spatial dims into the lane axis.
    x_flat = [xi.reshape(b, ci, hw) for xi, ci in zip(x_list, piece_channels)]
    # fc1 decomposed per concat piece (done once in the wrapper, tiny arrays).
    w1_t = jnp.transpose(w1).astype(jnp.float32)            # (C_total, hidden)
    w1_pieces, off = [], 0
    for ci in piece_channels:
        w1_pieces.append(w1_t[off:off + ci, :])
        off += ci
    w2_t = jnp.transpose(w2).astype(jnp.float32)             # (hidden, BANDS)

    stream_budget, vmem_limit = _vmem_budget()
    itemsize = jnp.dtype(x_list[0].dtype).itemsize
    can_tile_hw = (hw % 128 == 0)

    if b_tile is None:
        b_tile = (_pick_b_tile(b) if can_tile_hw
                  else _pick_b_tile_single(b, c_total, hw, itemsize, stream_budget))
    assert b % b_tile == 0

    if hw_tile is None:
        hw_tile = (_pick_hw_tile(hw, b_tile, c_total, itemsize, stream_budget)
                   if can_tile_hw else hw)
    assert hw % hw_tile == 0
    if hw_tile != hw:
        assert hw_tile % 128 == 0
    n_hw_steps = hw // hw_tile
    inv_hw = 1.0 / float(hw)

    cost = pl.CostEstimate(
        flops=int(b * c_total * hw
                  + 2 * b * c_total * hidden + 2 * b * hidden * BANDS_NUM_HSI),
        transcendentals=int(b * BANDS_NUM_HSI),
        bytes_accessed=int(sum(b * ci * hw for ci in piece_channels) * itemsize
                           + (c_total * hidden + hidden * BANDS_NUM_HSI) * 4
                           + b * BANDS_NUM_HSI * 4),
    )

    if n_hw_steps > 1:
        kernel = _make_tiled_kernel(piece_channels, b_tile, hidden, inv_hw,
                                    hw_tile, n_hw_steps)
        grid = (b // b_tile, n_hw_steps)
        in_specs = [pl.BlockSpec((b_tile, ci, hw_tile), lambda bi, hi: (bi, 0, hi))
                    for ci in piece_channels]
        # Tiny weights: constant index_map -> resident in VMEM, no per-step DMA.
        in_specs += [pl.BlockSpec((ci, hidden), lambda bi, hi: (0, 0))
                     for ci in piece_channels]
        in_specs += [pl.BlockSpec((hidden, BANDS_NUM_HSI), lambda bi, hi: (0, 0))]
        out_spec = pl.BlockSpec((b_tile, 1, BANDS_NUM_HSI), lambda bi, hi: (bi, 0, 0))
        scratch = [pltpu.VMEM((b_tile, ci, 128), jnp.float32)
                   for ci in piece_channels]
        dims = ("parallel", "arbitrary")
    else:
        kernel = _make_single_kernel(piece_channels, b_tile, hidden, inv_hw)
        grid = (b // b_tile,)
        in_specs = [pl.BlockSpec((b_tile, ci, hw), lambda bi: (bi, 0, 0))
                    for ci in piece_channels]
        in_specs += [pl.BlockSpec((ci, hidden), lambda bi: (0, 0))
                     for ci in piece_channels]
        in_specs += [pl.BlockSpec((hidden, BANDS_NUM_HSI), lambda bi: (0, 0))]
        out_spec = pl.BlockSpec((b_tile, 1, BANDS_NUM_HSI), lambda bi: (bi, 0, 0))
        scratch = []
        dims = ("parallel",)

    out = pl.pallas_call(
        kernel,
        out_shape=jax.ShapeDtypeStruct((b, 1, BANDS_NUM_HSI), jnp.float32),
        grid_spec=pltpu.PrefetchScalarGridSpec(
            num_scalar_prefetch=0,
            grid=grid,
            in_specs=in_specs,
            out_specs=out_spec,
            scratch_shapes=scratch,
        ),
        compiler_params=pltpu.CompilerParams(
            dimension_semantics=dims,
            vmem_limit_bytes=vmem_limit,
        ),
        cost_estimate=cost,
    )(*x_flat, *w1_pieces, w2_t)
    return out.reshape(b, BANDS_NUM_HSI)


# ----------------------------------------------------------------------------
# Reference + test
# ----------------------------------------------------------------------------
def _reference(x_list, w1, w2):
    x = jnp.concatenate([xi.astype(jnp.float32) for xi in x_list], axis=1)
    y = jnp.mean(x, axis=(2, 3))                              # (B, C)
    h = jnp.maximum(y @ w1.T, 0.0)
    logits = h @ w2.T
    return jax.nn.softmax(logits, axis=-1)


if __name__ == "__main__":
    # Small shapes consistent with the module: channel=64, reduction=16 -> hidden=4.
    B, C_TOTAL, H, W = 4, 64, 16, 16
    REDUCTION = 16
    HIDDEN = C_TOTAL // REDUCTION

    key = jax.random.PRNGKey(0)
    k1, k2, k3, k4 = jax.random.split(key, 4)

    # forward concatenates a list of tensors along the channel dim
    x0 = jax.random.normal(k1, (B, C_TOTAL // 2, H, W), dtype=jnp.float32)
    x1 = jax.random.normal(k2, (B, C_TOTAL // 2, H, W), dtype=jnp.float32)

    # PyTorch nn.Linear layout: (out_features, in_features), bias=False.
    w1 = 0.1 * jax.random.normal(k3, (HIDDEN, C_TOTAL), dtype=jnp.float32)
    w2 = 0.1 * jax.random.normal(k4, (BANDS_NUM_HSI, HIDDEN), dtype=jnp.float32)

    ref = _reference([x0, x1], w1, w2)

    # 1) Production tiling: hw_tile=128 forces 2 spatial steps so the
    #    accumulator / pl.when finalize path is exercised at this small size.
    out_tiled = jax.block_until_ready(se_layer_hsi([x0, x1], w1, w2, hw_tile=128))
    # 2) Default sizing: full spatial extent fits one block -> 1-D grid
    #    specialization (no scratch / pl.when machinery).
    out_single = jax.block_until_ready(se_layer_hsi([x0, x1], w1, w2))

    for out in (out_tiled, out_single):
        assert out.shape == (B, BANDS_NUM_HSI)
        err = jnp.max(jnp.abs(out - ref))
        assert jnp.allclose(out, ref, atol=1e-4, rtol=1e-4), \
            f"mismatch vs reference (max abs err {err})"
        assert jnp.allclose(jnp.sum(out, axis=-1), 1.0, atol=1e-4), \
            "softmax rows do not sum to 1"

    print("KERNEL_OK")
</pallas_src>

<mosaic_0001>
module attributes {stable_mosaic.version = 11 : i64} {
  func.func @kernel(%arg0: i32, %arg1: i32, %arg2: memref<2x32x128xf32, #tpu.memory_space<vmem>>, %arg3: memref<2x32x128xf32, #tpu.memory_space<vmem>>, %arg4: memref<32x4xf32, #tpu.memory_space<vmem>>, %arg5: memref<32x4xf32, #tpu.memory_space<vmem>>, %arg6: memref<4x14xf32, #tpu.memory_space<vmem>>, %arg7: memref<2x1x14xf32, #tpu.memory_space<vmem>>, %arg8: memref<2x32x128xf32, #tpu.memory_space<vmem>>, %arg9: memref<2x32x128xf32, #tpu.memory_space<vmem>>) attributes {dimension_semantics = [#tpu.dimension_semantics<parallel>, #tpu.dimension_semantics<arbitrary>], iteration_bounds = array<i64: 2, 2>, scalar_prefetch = 0 : i64, scratch_operands = 2 : i64, tpu.core_type = #tpu.core_type<tc>, window_params = [{transform_indices = @transform_0, window_bounds = array<i64: 2, 32, 128>}, {transform_indices = @transform_1, window_bounds = array<i64: 2, 32, 128>}, {pipeline_mode = #tpu.pipeline_mode<synchronous>, transform_indices = @transform_2, window_bounds = array<i64: 32, 4>}, {pipeline_mode = #tpu.pipeline_mode<synchronous>, transform_indices = @transform_3, window_bounds = array<i64: 32, 4>}, {pipeline_mode = #tpu.pipeline_mode<synchronous>, transform_indices = @transform_4, window_bounds = array<i64: 4, 14>}, {transform_indices = @transform_5, window_bounds = array<i64: 2, 1, 14>}]} {
    %c0_i32 = arith.constant 0 : i32
    %0 = arith.cmpi eq, %arg1, %c0_i32 : i32
    %1 = arith.extui %0 : i1 to i32
    %c0_i32_0 = arith.constant 0 : i32
    %2 = arith.cmpi ne, %1, %c0_i32_0 : i32
    scf.if %2 {
      %cst = arith.constant 0.000000e+00 : f32
      %14 = vector.broadcast %cst : f32 to vector<2x32x128xf32>
      %c0_19 = arith.constant 0 : index
      %c0_20 = arith.constant 0 : index
      %c0_21 = arith.constant 0 : index
      %15 = vector.load %arg8[%c0_19, %c0_20, %c0_21] : memref<2x32x128xf32, #tpu.memory_space<vmem>>, vector<2x32x128xf32>
      tpu.vector_store %arg8[%c0_19, %c0_20, %c0_21], %14 {strides = array<i32>} : memref<2x32x128xf32, #tpu.memory_space<vmem>>, vector<2x32x128xf32>,
      %cst_22 = arith.constant 0.000000e+00 : f32
      %16 = vector.broadcast %cst_22 : f32 to vector<2x32x128xf32>
      %c0_23 = arith.constant 0 : index
      %c0_24 = arith.constant 0 : index
      %c0_25 = arith.constant 0 : index
      %17 = vector.load %arg9[%c0_23, %c0_24, %c0_25] : memref<2x32x128xf32, #tpu.memory_space<vmem>>, vector<2x32x128xf32>
      tpu.vector_store %arg9[%c0_23, %c0_24, %c0_25], %16 {strides = array<i32>} : memref<2x32x128xf32, #tpu.memory_space<vmem>>, vector<2x32x128xf32>,
    } else {
    }
    %c0 = arith.constant 0 : index
    %c0_1 = arith.constant 0 : index
    %c0_2 = arith.constant 0 : index
    %3 = vector.load %arg8[%c0, %c0_1, %c0_2] : memref<2x32x128xf32, #tpu.memory_space<vmem>>, vector<2x32x128xf32>
    %c0_3 = arith.constant 0 : index
    %c0_4 = arith.constant 0 : index
    %c0_5 = arith.constant 0 : index
    %4 = vector.load %arg2[%c0_3, %c0_4, %c0_5] : memref<2x32x128xf32, #tpu.memory_space<vmem>>, vector<2x32x128xf32>
    %5 = arith.addf %3, %4 : vector<2x32x128xf32>
    %c0_6 = arith.constant 0 : index
    %c0_7 = arith.constant 0 : index
    %c0_8 = arith.constant 0 : index
    %6 = vector.load %arg8[%c0_6, %c0_7, %c0_8] : memref<2x32x128xf32, #tpu.memory_space<vmem>>, vector<2x32x128xf32>
    tpu.vector_store %arg8[%c0_6, %c0_7, %c0_8], %5 {strides = array<i32>} : memref<2x32x128xf32, #tpu.memory_space<vmem>>, vector<2x32x128xf32>,
    %c0_9 = arith.constant 0 : index
    %c0_10 = arith.constant 0 : index
    %c0_11 = arith.constant 0 : index
    %7 = vector.load %arg9[%c0_9, %c0_10, %c0_11] : memref<2x32x128xf32, #tpu.memory_space<vmem>>, vector<2x32x128xf32>
    %c0_12 = arith.constant 0 : index
    %c0_13 = arith.constant 0 : index
    %c0_14 = arith.constant 0 : index
    %8 = vector.load %arg3[%c0_12, %c0_13, %c0_14] : memref<2x32x128xf32, #tpu.memory_space<vmem>>, vector<2x32x128xf32>
    %9 = arith.addf %7, %8 : vector<2x32x128xf32>
    %c0_15 = arith.constant 0 : index
    %c0_16 = arith.constant 0 : index
    %c0_17 = arith.constant 0 : index
    %10 = vector.load %arg9[%c0_15, %c0_16, %c0_17] : memref<2x32x128xf32, #tpu.memory_space<vmem>>, vector<2x32x128xf32>
    tpu.vector_store %arg9[%c0_15, %c0_16, %c0_17], %9 {strides = array<i32>} : memref<2x32x128xf32, #tpu.memory_space<vmem>>, vector<2x32x128xf32>,
    %c1_i32 = arith.constant 1 : i32
    %11 = arith.cmpi eq, %arg1, %c1_i32 : i32
    %12 = arith.extui %11 : i1 to i32
    %c0_i32_18 = arith.constant 0 : i32
    %13 = arith.cmpi ne, %12, %c0_i32_18 : i32
    scf.if %13 {
      %cst = arith.constant 0.000000e+00 : f32
      %14 = vector.broadcast %cst : f32 to vector<2x4xf32>
      %c0_19 = arith.constant 0 : index
      %c0_20 = arith.constant 0 : index
      %c0_21 = arith.constant 0 : index
      %15 = vector.load %arg8[%c0_19, %c0_20, %c0_21] : memref<2x32x128xf32, #tpu.memory_space<vmem>>, vector<2x32x128xf32>
      %cst_22 = arith.constant dense<0.000000e+00> : vector<2x32xf32>
      %16 = vector.multi_reduction <add>, %15, %cst_22 [2] : vector<2x32x128xf32> to vector<2x32xf32>
      %cst_23 = arith.constant 3.906250e-03 : f32
      %17 = vector.broadcast %cst_23 : f32 to vector<2x32xf32>
      %18 = arith.mulf %16, %17 : vector<2x32xf32>
      %c0_24 = arith.constant 0 : index
      %c0_25 = arith.constant 0 : index
      %19 = vector.load %arg4[%c0_24, %c0_25] : memref<32x4xf32, #tpu.memory_space<vmem>>, vector<32x4xf32>
      %cst_26 = arith.constant dense<0.000000e+00> : vector<2x4xf32>
      %20 = tpu.matmul %18, %19, %cst_26 {dimension_numbers = #tpu.dot_dimension_numbers<[1], [0], [0], [1], [0, 0, 1, 1], [], []>} : vector<2x32xf32>, vector<32x4xf32>, vector<2x4xf32> -> vector<2x4xf32>
      %21 = arith.addf %14, %20 : vector<2x4xf32>
      %c0_27 = arith.constant 0 : index
      %c0_28 = arith.constant 0 : index
      %c0_29 = arith.constant 0 : index
      %22 = vector.load %arg9[%c0_27, %c0_28, %c0_29] : memref<2x32x128xf32, #tpu.memory_space<vmem>>, vector<2x32x128xf32>
      %cst_30 = arith.constant dense<0.000000e+00> : vector<2x32xf32>
      %23 = vector.multi_reduction <add>, %22, %cst_30 [2] : vector<2x32x128xf32> to vector<2x32xf32>
      %cst_31 = arith.constant 3.906250e-03 : f32
      %24 = vector.broadcast %cst_31 : f32 to vector<2x32xf32>
      %25 = arith.mulf %23, %24 : vector<2x32xf32>
      %c0_32 = arith.constant 0 : index
      %c0_33 = arith.constant 0 : index
      %26 = vector.load %arg5[%c0_32, %c0_33] : memref<32x4xf32, #tpu.memory_space<vmem>>, vector<32x4xf32>
      %cst_34 = arith.constant dense<0.000000e+00> : vector<2x4xf32>
      %27 = tpu.matmul %25, %26, %cst_34 {dimension_numbers = #tpu.dot_dimension_numbers<[1], [0], [0], [1], [0, 0, 1, 1], [], []>} : vector<2x32xf32>, vector<32x4xf32>, vector<2x4xf32> -> vector<2x4xf32>
      %28 = arith.addf %21, %27 : vector<2x4xf32>
      %cst_35 = arith.constant 0.000000e+00 : f32
      %29 = vector.broadcast %cst_35 : f32 to vector<2x4xf32>
      %30 = arith.maximumf %28, %29 : vector<2x4xf32>
      %c0_36 = arith.constant 0 : index
      %c0_37 = arith.constant 0 : index
      %31 = vector.load %arg6[%c0_36, %c0_37] : memref<4x14xf32, #tpu.memory_space<vmem>>, vector<4x14xf32>
      %cst_38 = arith.constant dense<0.000000e+00> : vector<2x14xf32>
      %32 = tpu.matmul %30, %31, %cst_38 {dimension_numbers = #tpu.dot_dimension_numbers<[1], [0], [0], [1], [0, 0, 1, 1], [], []>} : vector<2x4xf32>, vector<4x14xf32>, vector<2x14xf32> -> vector<2x14xf32>
      %cst_39 = arith.constant dense<0xFF800000> : vector<2xf32>
      %33 = vector.multi_reduction <maximumf>, %32, %cst_39 [1] : vector<2x14xf32> to vector<2xf32>
      %34 = vector.shape_cast %33 : vector<2xf32> to vector<2x1xf32>
      %35 = vector.broadcast %34 : vector<2x1xf32> to vector<2x14xf32>
      %36 = arith.subf %32, %35 : vector<2x14xf32>
      %37 = math.exp %36 : vector<2x14xf32>
      %cst_40 = arith.constant dense<0.000000e+00> : vector<2xf32>
      %38 = vector.multi_reduction <add>, %37, %cst_40 [1] : vector<2x14xf32> to vector<2xf32>
      %39 = vector.shape_cast %38 : vector<2xf32> to vector<2x1xf32>
      %40 = vector.broadcast %39 : vector<2x1xf32> to vector<2x14xf32>
      %41 = arith.divf %37, %40 : vector<2x14xf32>
      %c0_41 = arith.constant 0 : index
      %c0_42 = arith.constant 0 : index
      %c0_43 = arith.constant 0 : index
      %42 = vector.load %arg7[%c0_41, %c0_42, %c0_43] : memref<2x1x14xf32, #tpu.memory_space<vmem>>, vector<2x1x14xf32>
      %43 = vector.shape_cast %42 : vector<2x1x14xf32> to vector<2x14xf32>
      %44 = vector.shape_cast %41 : vector<2x14xf32> to vector<2x1x14xf32>
      tpu.vector_store %arg7[%c0_41, %c0_42, %c0_43], %44 {strides = array<i32>} : memref<2x1x14xf32, #tpu.memory_space<vmem>>, vector<2x1x14xf32>,
    } else {
    }
    return
  }
  func.func @transform_0(%arg0: i32, %arg1: i32) -> (i32, i32, i32) {
    %c0_i32 = arith.constant 0 : i32
    %c0_i32_0 = arith.constant 0 : i32
    return %arg0, %c0_i32, %arg1 : i32, i32, i32
  }
  func.func @transform_1(%arg0: i32, %arg1: i32) -> (i32, i32, i32) {
    %c0_i32 = arith.constant 0 : i32
    %c0_i32_0 = arith.constant 0 : i32
    return %arg0, %c0_i32, %arg1 : i32, i32, i32
  }
  func.func @transform_2(%arg0: i32, %arg1: i32) -> (i32, i32) {
    %c0_i32 = arith.constant 0 : i32
    %c0_i32_0 = arith.constant 0 : i32
    %c0_i32_1 = arith.constant 0 : i32
    return %c0_i32, %c0_i32_0 : i32, i32
  }
  func.func @transform_3(%arg0: i32, %arg1: i32) -> (i32, i32) {
    %c0_i32 = arith.constant 0 : i32
    %c0_i32_0 = arith.constant 0 : i32
    %c0_i32_1 = arith.constant 0 : i32
    return %c0_i32, %c0_i32_0 : i32, i32
  }
  func.func @transform_4(%arg0: i32, %arg1: i32) -> (i32, i32) {
    %c0_i32 = arith.constant 0 : i32
    %c0_i32_0 = arith.constant 0 : i32
    %c0_i32_1 = arith.constant 0 : i32
    return %c0_i32, %c0_i32_0 : i32, i32
  }
  func.func @transform_5(%arg0: i32, %arg1: i32) -> (i32, i32, i32) {
    %c0_i32 = arith.constant 0 : i32
    %c0_i32_0 = arith.constant 0 : i32
    %c0_i32_1 = arith.constant 0 : i32
    return %arg0, %c0_i32, %c0_i32_0 : i32, i32, i32
  }
}

</mosaic_0001>

<bundles_post_ra>
// kernel: tpu_custom_call.1
= control target key start
LH: loop header
LB: loop body
LE: loop exit
PB: predicated region body
PF: predicated region fallthrough
CT: control target
= control target key end

     0   :  { %s1764_s0 = inlined_call_operand.hbm [shape: f32[4,32,256], index: 0, kind: input, shape index: {}]   ;;  %s1765_s1 = inlined_call_operand.hbm [shape: f32[4,32,256], index: 1, kind: input, shape index: {}]   ;;  %s1766_s2 = inlined_call_operand.vmem [shape: f32[32,4], index: 2, kind: input, shape index: {}]   ;;  %s1767_s3 = inlined_call_operand.vmem [shape: f32[32,4], index: 3, kind: input, shape index: {}]   ;;  %s1768_s4 = inlined_call_operand.vmem [shape: f32[4,14], index: 4, kind: input, shape index: {}]   ;;  %s1769_s5 = inlined_call_operand.hbm [shape: f32[4,1,14], index: 5, kind: output, shape index: {}]  }
   0x1   :  { %1780 = sst [smem:[#allocation21_spill]] %s1764_s0 }
   0x2   :  { %10 = vsyncpa [#allocation5], 0 }
   0x3   :  { %12 = vsyncpa [#allocation5 + $0x1], 0 }
   0x4   :  { %13 = vsyncpa [#allocation8], 0 }
   0x5   :  { %15 = vsyncpa [#allocation8 + $0x1], 0 }
   0x6   :  { %16 = vsyncpa [#allocation6], 0 }
   0x7   :  { %18 = vsyncpa [#allocation6 + $0x1], 0  ;;  %s1393_s18 = smov 0   ;;  %s1395_s19 = smov 0  }
   0x8   :  { %s1397_s20 = smov 0   ;;  %s1399_s21 = smov 0  }
   0x9   :  { %s1401_s22 = smov 0   ;;  %s1403_s23 = smov 0  }
   0xa   :  { %s1405_s24 = smov 0   ;;  %s1407_s25 = smov 0  }
   0xb   :  { %s1409_s26 = smov 0   ;;  %s1411_s27 = smov 0  }
   0xc   :  { %s1413_s28 = smov 0  }
   0xd LB: > { %1781 = sst [smem:[#allocation13_spill]] %s1316_s20  ;;  %s959_s29 = sadd.s32 4294967295, %s1348_s28   ;;  %s1348_s28 = sphi %s1413_s28, %s24_s28   ;;  %s1344_s27 = sphi %s1411_s27, %s1809_s27   ;;  %s1340_s26 = sphi %s1409_s26, %s1808_s26   ;;  %s1336_s25 = sphi %s1407_s25, %s1807_s25   ;;  %s1332_s24 = sphi %s1405_s24, %s1806_s24   ;;  %s1328_s23 = sphi %s1403_s23, %s1805_s23   ;;  %s1324_s22 = sphi %s1401_s22, %s1813_s22   ;;  %s1320_s21 = sphi %s1399_s21, %s1812_s21   ;;  %s1316_s20 = sphi %s1397_s20, %s1803_s20   ;;  %s1312_s19 = sphi %s1395_s19, %s1811_s19   ;;  %s1308_s18 = sphi %s1393_s18, %s1810_s18  }
   0xe   : > { %1782 = sst [smem:[#allocation14_spill]] %s1328_s23  ;;  %s960_s30 = sadd.s32 4294967294, %s1348_s28  }
   0xf   : > { %1783 = sst [smem:[#allocation15_spill]] %s1340_s26  ;;  %s33_s6 = sadd.s32 1, %s1340_s26 }
  0x10   : > { %1784 = sst [smem:[#allocation16_spill]] %s1344_s27  ;;  %s36_s7 = sadd.s32 1, %s1344_s27 }
  0x11   : > { %p34_p0 = scmp.ge.s32.totalorder %s33_s6, 2  ;;  %s45_s8 = sadd.s32 1, %s1328_s23 }
  0x12   : > { %p52_p1 = scmp.ne.s32.totalorder %s1328_s23, %s1324_s22  ;;  %p53_p2 = scmp.eq.s32.totalorder %s1348_s28, 0 }
  0x13   : > { %s1815_s6 = smov (%p34_p0, %s33_s6), 0  ;;  %s1817_s7 = smov (!%p34_p0, %s36_s7), %s1344_s27 }
  0x14   : > { %1785 = sst [smem:[#allocation17_spill]] %s1815_s6  ;;  %s41_s9 = ssub.s32 %s1340_s26, %s1815_s6 }
  0x15   : > { %p1459_p3 = por %p53_p2, %p52_p1  ;;  %p38_p4 = scmp.ge.s32.totalorder %s1817_s7, 2 }
  0x16   : > { %p58_p5 = scmp.ne.s32.totalorder %s1324_s22, %s1320_s21  ;;  %p59_p6 = scmp.eq.s32.totalorder %s959_s29, 0 }
  0x17   : > { %s162_s11 = sadd.s32 1, %s1316_s20  ;;  %s1819_s7 = smov (%p38_p4, %s1817_s7), 0 }
  0x18   : > { %1787 = sst [smem:[#allocation18_spill]] %s1819_s7  ;;  %p1467_p7 = por %p59_p6, %p58_p5 }
  0x19   : > { %p172_p8 = scmp.ne.s32.totalorder %s1316_s20, %s1312_s19  ;;  %s40_s13 = ssub.s32 %s1344_s27, %s1819_s7 }
  0x1a   : > { %s1788_s12 = scalar_select %p1467_p7, 1, 0 }
  0x1b   : > { %p173_p9 = scmp.eq.s32.totalorder %s959_s29, 3  ;;  %s42_s14 = sor.u32 %s41_s9, %s40_s13 }
  0x1c   : > { %p160_p10 = scmp.eq.s32.totalorder %s40_s13, 0  ;;  %p43_p11 = scmp.eq.s32.totalorder %s42_s14, 0 }
  0x1d   : > { %p1475_p12 = por %p173_p9, %p172_p8  ;;  %p178_p13 = scmp.ne.s32.totalorder %s1312_s19, %s1308_s18 }
  0x1e   : > { %s1480_s16 = scalar_select %p160_p10, %s1316_s20, %s162_s11  }
  0x1f   : > { %s1789_s15 = scalar_select %p1475_p12, 1, 0 }
  0x20   : > { %1790 = sst [smem:[#allocation19_spill]] %s1480_s16  ;;  %p179_p0 = scmp.eq.s32.totalorder %s960_s30, 3 }
  0x21   : > { %s1483_s17 = scalar_select %p43_p11, %s1328_s23, %s45_s8  }
  0x22   : > { %p1058_p1 = scmp.lt.s32.totalorder %s1348_s28, 4  ;;  %p1488_p2 = por %p179_p0, %p178_p13 }
  0x23   : > { %1791 = sst [smem:[#allocation20_spill]] %s1483_s17  ;;  %s1493_s29 = sand.u32 1, %s1328_s23  }
  0x24   : > { %s1792_s21 = scalar_select %p1488_p2, 1, 0 }
  0x25   : > { %s1772_s9 = sshll.u32 %s1493_s29, 6  ;;  %s986_s13 = sshll.u32 %s1344_s27, 4 }
  0x26   : > { %s1498_s14 = sadd.s32 %s1340_s26, %s986_s13  ;;  %s212_s8 = scalar_lea.vmem [#allocation4], %s1772_s9 }
  0x27   : > { %s221_s11 = sshll.u32 %s212_s8, 4  ;;  %s1773_s30 = sshll.u32 %s1498_s14, 7  ;;  %s1503_s11 = int_to_ptr.vmem [resolvable:$true] %s221_s11 }
  0x28   : > { %s1793_s0 = sld [smem:[#allocation21_spill]]  ;;  %p1514_p4 = pnand %p1058_p1, %p1459_p3 }
  0x2a   : > { %p1164_p6 = pneg %p1514_p4 }
  0x2e   : > { %s1510_s17 = scalar_lea.hbm %s1793_s0, %s1773_s30  ;;  %s1167_s10 = scalar_lea.hbm %s1793_s0, 4096 }
  0x2f   : > { %s1162_s9 = scalar_lea.hbm %s1510_s17, 1024  ;;  %p1168_p3 = scmp.lt.u32.totalorder %s1510_s17, %s1793_s0 }
  0x30   : > { %p1163_p5 = scmp.ne.s32.totalorder %s1510_s17, %s1162_s9  ;;  %p1169_p10 = scmp.lt.u32.totalorder %s1167_s10, %s1162_s9 }
  0x31   : > { %p1171_p13 = scmp.lt.u32.totalorder %s1162_s9, %s1510_s17 }
  0x32   : > { %p1165_p8 = pnand %p1164_p6, %p1163_p5  ;;  %p1170_p11 = por %p1169_p10, %p1168_p3 }
  0x34   : > { %p1166_p9 = pneg %p1165_p8  ;;  %p1172_p0 = por %p1171_p13, %p1170_p11 }
  0x36   : > { %p1173_p1 = pnand %p1172_p0, %p1166_p9 }
  0x38   : > { %1176 = shalt.err (!%p1173_p1)
}
  0x39   : > { %s1177_s8 = scalar_lea.vmem %s1503_s11, 1024  ;;  %s1350_s6 = smov [#allocation4]  }
  0x3a   : > { %p1178_p5 = scmp.ne.s32.totalorder %s1503_s11, %s1177_s8  ;;  %s1182_s7 = sshll.u32 %s1350_s6, 4  ;;  %s1183_s7 = int_to_ptr.vmem [resolvable:$false] %s1182_s7 }
  0x3b   : > { %s1184_s27 = scalar_lea.vmem %s1183_s7, 2048  ;;  %p1185_p12 = scmp.lt.s32.totalorder %s1503_s11, %s1183_s7 }
  0x3c   : > { %p1180_p8 = pnand %p1178_p5, %p1164_p6  ;;  %p1186_p3 = scmp.lt.s32.totalorder %s1184_s27, %s1177_s8 }
  0x3e   : > { %p1181_p2 = pneg %p1180_p8  ;;  %p1187_p10 = por %p1186_p3, %p1185_p12 }
  0x40   : > { %p1188_p11 = pnand %p1187_p10, %p1181_p2 }
  0x42   : > { %1191 = shalt.err (!%p1188_p11)
}
  0x43   : > { %s1351_s9 = smov 256   ;;  %s1352_s30 = smov 128  }
  0x44   : > { %s1353_s10 = smov 8   ;;  %s1795_s8 = scalar_lea.sflag [#allocation5], %s1493_s29 }
  0x45   : > { %1050 = dma.hbm_to_vmem [thread:$0]  (!%p1514_p4), %s1510_s17, 1024, %s1503_s11, %s1795_s8, %s1351_s9, %s1352_s30, %s1353_s10  }
  0x46   : > { %p971_p12 = scmp.ge.s32.totalorder %s1348_s28, 1  ;;  %p252_p2 = scmp.lt.s32.totalorder %s1348_s28, 5 }
  0x47   : > { %s1797_s7 = sshll.u32 %s1498_s14, 7  ;;  %s1798_s23 = sshll.u32 %s1493_s29, 6 }
  0x48   : > { %p1551_p9 = pnand %p971_p12, %p252_p2  ;;  %s1560_s26 = scalar_lea.hbm %s1765_s1, %s1797_s7 }
  0x49   : > { %s235_s16 = scalar_lea.vmem [#allocation7], %s1798_s23  ;;  %s232_s17 = scalar_lea.sflag [#allocation8], %s1493_s29 }
  0x4a   : > { %s244_s20 = sshll.u32 %s235_s16, 4  ;;  %s1192_s11 = scalar_lea.hbm %s1560_s26, 1024  ;;  %s1564_s20 = int_to_ptr.vmem [resolvable:$true] %s244_s20 }
  0x4b   : > { %p1193_p13 = scmp.ne.s32.totalorder %s1560_s26, %s1192_s11  ;;  %s1197_s8 = scalar_lea.hbm %s1765_s1, 4096 }
  0x4c   : > { %p1198_p5 = scmp.lt.u32.totalorder %s1560_s26, %s1765_s1  ;;  %p1199_p8 = scmp.lt.u32.totalorder %s1197_s8, %s1192_s11 }
  0x4d   : > { %p1195_p0 = pnand %p1193_p13, %p1164_p6  ;;  %p1201_p10 = scmp.lt.u32.totalorder %s1192_s11, %s1560_s26 }
  0x4e   : > { %p1200_p3 = por %p1199_p8, %p1198_p5 }
  0x4f   : > { %p1196_p1 = pneg %p1195_p0 }
  0x50   : > { %p1202_p11 = por %p1201_p10, %p1200_p3 }
  0x52   : > { %p1203_p12 = pnand %p1202_p11, %p1196_p1 }
  0x54   : > { %1206 = shalt.err (!%p1203_p12)
}
  0x55   : > { %s1207_s23 = scalar_lea.vmem %s1564_s20, 1024  ;;  %s1354_s16 = smov [#allocation7]  }
  0x56   : > { %p1208_p2 = scmp.ne.s32.totalorder %s1564_s20, %s1207_s23  ;;  %s1212_s14 = sshll.u32 %s1354_s16, 4  ;;  %s1213_s14 = int_to_ptr.vmem [resolvable:$false] %s1212_s14 }
  0x57   : > { %s1214_s0 = scalar_lea.vmem %s1213_s14, 2048  ;;  %p1215_p7 = scmp.lt.s32.totalorder %s1564_s20, %s1213_s14 }
  0x58   : > { %p1210_p13 = pnand %p1208_p2, %p1164_p6  ;;  %p1216_p5 = scmp.lt.s32.totalorder %s1214_s0, %s1207_s23 }
  0x5a   : > { %p1211_p0 = pneg %p1210_p13  ;;  %p1217_p8 = por %p1216_p5, %p1215_p7 }
  0x5c   : > { %p1218_p3 = pnand %p1217_p8, %p1211_p0 }
  0x5e   : > { %1221 = shalt.err (!%p1218_p3)
}
  0x5f   : > { %1053 = dma.hbm_to_vmem [thread:$0]  (!%p1514_p4), %s1560_s26, 1024, %s1564_s20, %s232_s17, %s1351_s9, %s1352_s30, %s1353_s10  }
  0x60   : > { %256 = sbr.rel (%p1551_p9) target bundleno = 1081 (0x439), region = 40  ;;  %s258_s11 = sand.u32 (!%p1551_p9), 1, %s1324_s22  }
  0x61   : > { %s972_s8 = sshll.u32 (!%p1551_p9), %s258_s11, 6  ;;  %s259_s7 = scalar_lea.sflag (!%p1551_p9), [#allocation5], %s258_s11 }
  0x62   : > { %s1598_s27 = scalar_lea.vmem (!%p1551_p9), [#allocation4], %s972_s8  ;;  %p1799_p7 = scmp.ne.s32.totalorder (!%p1551_p9), %s1788_s12, 0 }
  0x67   : > { %1295 = dma.done.wait (%p1799_p7), %s259_s7, 1024  }
  0x68   : > { %1297 = vsyncadd (%p1799_p7), %s259_s7, 4294966272  ;;  %s268_s29 = scalar_lea.sflag [#allocation8], %s258_s11  ;;  %s1604_s13 = scalar_lea.vmem [#allocation7], %s972_s8 }
  0x69   : > { %1299 = dma.done.wait (%p1799_p7), %s268_s29, 1024  }
  0x6a   : > { %1301 = vsyncadd (%p1799_p7), %s268_s29, 4294966272  ;;  %s300_s20 = sand.u32 1, %s1312_s19   ;;  %p975_p4 = scmp.ne.s32.totalorder %s1332_s24, 0 }
  0x6b   : > { %s974_s26 = sshll.u32 %s300_s20, 1  ;;  %v1355_v0 = vmov (!%p975_p4), 0.0  }
  0x6c   : > { %s1613_s9 = scalar_lea.vmem [#allocation9], %s974_s26  ;;  %309 = sbr.rel (%p975_p4) target bundleno = 116 (0x74), region = 52  ;;  %310 = vst [vmem:[#allocation2] sm:$0xff] (!%p975_p4), %v1355_v0  ;;  %311 = vst [vmem:[#allocation2 + $0x8] sm:$0xff] (!%p975_p4), %v1355_v0 }
  0x6d   : > { %312 = vst [vmem:[#allocation2 + $0x10] sm:$0xff] (!%p975_p4), %v1355_v0  ;;  %313 = vst [vmem:[#allocation2 + $0x18] sm:$0xff] (!%p975_p4), %v1355_v0 }
  0x6e   : > { %314 = vst [vmem:[#allocation2 + $0x20] sm:$0xff] (!%p975_p4), %v1355_v0  ;;  %315 = vst [vmem:[#allocation2 + $0x28] sm:$0xff] (!%p975_p4), %v1355_v0 }
  0x6f   : > { %316 = vst [vmem:[#allocation2 + $0x30] sm:$0xff] (!%p975_p4), %v1355_v0  ;;  %317 = vst [vmem:[#allocation2 + $0x38] sm:$0xff] (!%p975_p4), %v1355_v0 }
  0x70   : > { %318 = vst [vmem:[#allocation3] sm:$0xff] (!%p975_p4), %v1355_v0  ;;  %319 = vst [vmem:[#allocation3 + $0x8] sm:$0xff] (!%p975_p4), %v1355_v0 }
  0x71   : > { %320 = vst [vmem:[#allocation3 + $0x10] sm:$0xff] (!%p975_p4), %v1355_v0  ;;  %321 = vst [vmem:[#allocation3 + $0x18] sm:$0xff] (!%p975_p4), %v1355_v0 }
  0x72   : > { %322 = vst [vmem:[#allocation3 + $0x20] sm:$0xff] (!%p975_p4), %v1355_v0  ;;  %323 = vst [vmem:[#allocation3 + $0x28] sm:$0xff] (!%p975_p4), %v1355_v0 }
  0x73   : > { %324 = vst [vmem:[#allocation3 + $0x30] sm:$0xff] %v1355_v0  ;;  %325 = vst [vmem:[#allocation3 + $0x38] sm:$0xff] %v1355_v0 }
  0x74 PF: > { %v326_v1 = vld [vmem:[#allocation2] sm:$0xff]  ;;  %v327_v3 = vld [vmem:[#allocation2 + $0x8] sm:$0xff]  ;;  %v336_v7 = vld [vmem:[%s1598_s27 + $0x10] sm:$0xff]  ;;  %p976_p6 = scmp.ne.s32.totalorder %s1332_s24, 1 }
  0x75   : > { %v334_v2 = vld [vmem:[%s1598_s27] sm:$0xff]  ;;  %v335_v5 = vld [vmem:[%s1598_s27 + $0x8] sm:$0xff]  ;;  %v328_v6 = vld [vmem:[#allocation2 + $0x10] sm:$0xff]  ;;  %vm1357_vm0 = vmmov (!%p976_p6), 0   ;;  %vm485_vm1 = vcmask (!%p976_p6), 130112   ;;  %vm492_vm2 = vcmask (!%p976_p6), 195712  }
  0x76   : > { %v342_v4 = vadd.f32 %v334_v2, %v326_v1  ;;  %v343_v8 = vadd.f32 %v335_v5, %v327_v3  ;;  %v344_v9 = vadd.f32 %v336_v7, %v328_v6  ;;  %v329_v10 = vld [vmem:[#allocation2 + $0x18] sm:$0xff]  ;;  %v330_v12 = vld [vmem:[#allocation2 + $0x20] sm:$0xff]  ;;  %v331_v15 = vld [vmem:[#allocation2 + $0x28] sm:$0xff]  ;;  %vm499_vm3 = vcmask (!%p976_p6), 261312  }
  0x77   : > { %v337_v11 = vld [vmem:[%s1598_s27 + $0x18] sm:$0xff]  ;;  %v338_v14 = vld [vmem:[%s1598_s27 + $0x20] sm:$0xff]  ;;  %v339_v16 = vld [vmem:[%s1598_s27 + $0x28] sm:$0xff]  ;;  %vm520_vm4 = vcmask (!%p976_p6), 1041409   ;;  %vm522_vm5 = vcmask (!%p976_p6), 261120   ;;  %vm720_vm6 = vcmask (!%p976_p6), 1043456  }
  0x78   : > { %350 = vst [vmem:[#allocation2] sm:$0xff] %v342_v4  ;;  %v345_v13 = vadd.f32 %v337_v11, %v329_v10  ;;  %351 = vst [vmem:[#allocation2 + $0x8] sm:$0xff] %v343_v8  ;;  %v346_v17 = vadd.f32 %v338_v14, %v330_v12  ;;  %v347_v18 = vadd.f32 %v339_v16, %v331_v15  ;;  %v332_v19 = vld [vmem:[#allocation2 + $0x30] sm:$0xff]  ;;  %v333_v21 = vld [vmem:[#allocation2 + $0x38] sm:$0xff]  ;;  %v1356_v4 = vmov (!%p976_p6), 0.0|0.0  }
  0x79   : > { %352 = vst [vmem:[#allocation2 + $0x10] sm:$0xff] %v344_v9  ;;  %v340_v20 = vld [vmem:[%s1598_s27 + $0x30] sm:$0xff]  ;;  %v341_v23 = vld [vmem:[%s1598_s27 + $0x38] sm:$0xff]  ;;  %v358_v24 = vld [vmem:[#allocation3] sm:$0xff]  ;;  %1034 = vmatprep.subr.bf16.mxu0 (!%p976_p6), %v1356_v4  ;;  %1028 = vmatprep.subr.bf16.mxu1 (!%p976_p6), %v1356_v4  ;;  %vm716_vm7 = vcmask (!%p976_p6), 31744   ;;  %vm794_vm8 = vcmask (!%p976_p6), 107520  }
  0x7a   : > { %353 = vst [vmem:[#allocation2 + $0x18] sm:$0xff] %v345_v13  ;;  %v348_v22 = vadd.f32 %v340_v20, %v332_v19  ;;  %v366_v25 = vld [vmem:[%s1604_s13] sm:$0xff]  ;;  %354 = vst [vmem:[#allocation2 + $0x20] sm:$0xff] %v346_v17  ;;  %v349_v26 = vadd.f32 %v341_v23, %v333_v21  ;;  %v359_v28 = vld [vmem:[#allocation3 + $0x8] sm:$0xff]  ;;  %v1358_v13 = vmov (!%p976_p6), 0.0   ;;  %v474_v19 = vlaneseq (!%p976_p6) }
  0x7b   : > { %355 = vst [vmem:[#allocation2 + $0x28] sm:$0xff] %v347_v18  ;;  %v374_v27 = vadd.f32 %v366_v25, %v358_v24  ;;  %v367_v29 = vld [vmem:[%s1604_s13 + $0x8] sm:$0xff]  ;;  %v360_v30 = vld [vmem:[#allocation3 + $0x10] sm:$0xff]  ;;  %v361_v33 = vld [vmem:[#allocation3 + $0x18] sm:$0xff]  ;;  %1020 = vmatprep.mubr.msk.f32.mxu0 (!%p976_p6), %vm1357_vm0, %v1358_v13  ;;  %1009 = vmatprep.mubr.msk.f32.mxu1 (!%p976_p6), %vm1357_vm0, %v1358_v13  ;;  %vm831_vm9 = vcmask (!%p976_p6), 106496  }
  0x7c   : > { %356 = vst [vmem:[#allocation2 + $0x30] sm:$0xff] %v348_v22  ;;  %v375_v31 = vadd.f32 %v367_v29, %v359_v28  ;;  %v368_v32 = vld [vmem:[%s1604_s13 + $0x10] sm:$0xff]  ;;  %v369_v34 = vld [vmem:[%s1604_s13 + $0x18] sm:$0xff]  ;;  %357 = vst [vmem:[#allocation2 + $0x38] sm:$0xff] %v349_v26  ;;  %v475_v22 = vand.u32 (!%p976_p6), 127, %v474_v19  ;;  %v1662_v26 = vshrl.u32 (!%p976_p6), %v474_v19, 7 }
  0x7d   : > { %382 = vst [vmem:[#allocation3] sm:$0xff] %v374_v27  ;;  %v376_v35 = vadd.f32 %v368_v32, %v360_v30  ;;  %v377_v36 = vadd.f32 %v369_v34, %v361_v33  ;;  %v362_v37 = vld [vmem:[#allocation3 + $0x20] sm:$0xff]  ;;  %v363_v39 = vld [vmem:[#allocation3 + $0x28] sm:$0xff]  ;;  %v364_v42 = vld [vmem:[#allocation3 + $0x30] sm:$0xff]  ;;  %393 = sbr.rel (%p976_p6) target bundleno = 1055 (0x41f), region = 56 }
  0x7e   : > { %v370_v38 = vld [vmem:[%s1604_s13 + $0x20] sm:$0xff]  ;;  %383 = vst [vmem:[#allocation3 + $0x8] sm:$0xff] %v375_v31  ;;  %v371_v41 = vld [vmem:[%s1604_s13 + $0x28] sm:$0xff]  ;;  %v372_v43 = vld [vmem:[%s1604_s13 + $0x30] sm:$0xff]  ;;  %v480_v25 = vadd.s32 (!%p976_p6), 4294967288, %v475_v22  ;;  %v487_v27 = vadd.s32 (!%p976_p6), 4294967280, %v475_v22  ;;  %v478_v34 = vsub.s32 (!%p976_p6), %v475_v22, %v1662_v26 }
  0x7f   : > { %v378_v40 = vadd.f32 %v370_v38, %v362_v37  ;;  %384 = vst [vmem:[#allocation3 + $0x10] sm:$0xff] %v376_v35  ;;  %385 = vst [vmem:[#allocation3 + $0x18] sm:$0xff] %v377_v36  ;;  %v379_v44 = vadd.f32 %v371_v41, %v363_v39  ;;  %v380_v45 = vadd.f32 %v372_v43, %v364_v42  ;;  %v365_v46 = vld [vmem:[#allocation3 + $0x38] sm:$0xff]  ;;  %v394_v50 = vld [vmem:[#allocation2] sm:$0xff] (!%p976_p6)  ;;  %v494_v30 = vadd.s32 (!%p976_p6), 4294967272, %v475_v22 }
  0x80   : > { %v373_v47 = vld [vmem:[%s1604_s13 + $0x38] sm:$0xff]  ;;  %402 = vadd.xlane.f32.xlu0 (!%p976_p6), %v394_v50  ;;  %v395_v52 = vld [vmem:[#allocation2 + $0x8] sm:$0xff] (!%p976_p6)  ;;  %v396_v58 = vld [vmem:[#allocation2 + $0x10] sm:$0xff] (!%p976_p6)  ;;  %v483_v31 = vsub.s32 (!%p976_p6), %v480_v25, %v1662_v26  ;;  %v490_v37 = vsub.s32 (!%p976_p6), %v487_v27, %v1662_v26 }
  0x81   : > { %386 = vst [vmem:[#allocation3 + $0x20] sm:$0xff] %v378_v40  ;;  %v381_v48 = vadd.f32 %v373_v47, %v365_v46  ;;  %387 = vst [vmem:[#allocation3 + $0x28] sm:$0xff] %v379_v44  ;;  %v398_v49 = vld [vmem:[#allocation2 + $0x20] sm:$0xff] (!%p976_p6)  ;;  %v397_v62 = vld [vmem:[#allocation2 + $0x18] sm:$0xff] (!%p976_p6)  ;;  %v497_v42 = vsub.s32 (!%p976_p6), %v494_v30, %v1662_v26 }
  0x82   : > { %388 = vst [vmem:[#allocation3 + $0x30] sm:$0xff] %v380_v45  ;;  %410 = vadd.xlane.f32.xlu1 (!%p976_p6), %v398_v49  ;;  %v399_v51 = vld [vmem:[#allocation2 + $0x28] sm:$0xff] (!%p976_p6)  ;;  %v426_v1 = vld [vmem:[%s1766_s2] sm:$0xff] (!%p976_p6)  ;;  %v428_v7 = vld [vmem:[%s1766_s2 + $0x10] sm:$0xff] (!%p976_p6) }
  0x83   : > { %389 = vst [vmem:[#allocation3 + $0x38] sm:$0xff] %v381_v48  ;;  %v400_v57 = vld [vmem:[#allocation2 + $0x30] sm:$0xff] (!%p976_p6)  ;;  %v401_v61 = vld [vmem:[#allocation2 + $0x38] sm:$0xff] (!%p976_p6)  ;;  %v427_v2 = vld [vmem:[%s1766_s2 + $0x8] sm:$0xff] (!%p976_p6) }
  0x84   : > { %404 = vadd.xlane.f32.xlu0 %v395_v52  ;;  %v430_v54 = vld [vmem:[#allocation3] sm:$0xff]  ;;  %v1035_v3 = vpack.c.bf16 %v427_v2, %v426_v1  ;;  %v463_v6 = vld [vmem:[%s1767_s3 + $0x8] sm:$0xff]  ;;  %v429_v9 = vld [vmem:[%s1766_s2 + $0x18] sm:$0xff] }
  0x85   : > { %v431_v53 = vld [vmem:[#allocation3 + $0x8] sm:$0xff]  ;;  %v462_v5 = vld [vmem:[%s1767_s3] sm:$0xff]  ;;  %v1038_v10 = vpack.c.bf16 %v429_v9, %v428_v7  ;;  %v464_v11 = vld [vmem:[%s1767_s3 + $0x10] sm:$0xff] }
  0x86   : > { %412 = vadd.xlane.f32.xlu1 %v399_v51  ;;  %v432_v60 = vld [vmem:[#allocation3 + $0x10] sm:$0xff]  ;;  %v433_v0 = vld [vmem:[#allocation3 + $0x18] sm:$0xff]  ;;  %1036 = vmatpush3.bf16.msra.mxu0 %v1035_v3  ;;  %v1029_v8 = vpack.c.bf16 %v463_v6, %v462_v5 }
  0x87   : > { %1037 = vmatprep.subr.bf16.mxu0 %v1356_v4  ;;  %v465_v12 = vld [vmem:[%s1767_s3 + $0x18] sm:$0xff] }
  0x88   : > { %438 = vadd.xlane.f32.xlu0 %v430_v54  ;;  %v435_v55 = vld [vmem:[#allocation3 + $0x28] sm:$0xff]  ;;  %v434_v56 = vld [vmem:[#allocation3 + $0x20] sm:$0xff]  ;;  %1030 = vmatpush3.bf16.msra.mxu1 %v1029_v8  ;;  %v1032_v14 = vpack.c.bf16 %v465_v12, %v464_v11 }
  0x89   : > { %v436_v59 = vld [vmem:[#allocation3 + $0x30] sm:$0xff]  ;;  %1031 = vmatprep.subr.bf16.mxu1 %v1356_v4 }
  0x8a   : > { %440 = vadd.xlane.f32.xlu1 %v431_v53  ;;  %v437_v63 = vld [vmem:[#allocation3 + $0x38] sm:$0xff]  ;;  %1039 = vmatpush3.bf16.msra.mxu0 %v1038_v10 }
  0x8c   : > { %446 = vadd.xlane.f32.xlu0 %v434_v56  ;;  %1033 = vmatpush3.bf16.msra.mxu1 %v1032_v14 }
  0x8d   : > { %1023 = vmatprep.subr.mxu1 %v1358_v13 }
  0x8e   : > { %448 = vadd.xlane.f32.xlu1 %v435_v55 }
  0x90   : > { %406 = vadd.xlane.f32.xlu0 %v396_v58 }
  0x92   : > { %414 = vadd.xlane.f32.xlu1 %v400_v57 }
  0x94   : > { %442 = vadd.xlane.f32.xlu0 %v432_v60 }
  0x96   : > { %450 = vadd.xlane.f32.xlu1 %v436_v59 }
  0x98   : > { %408 = vadd.xlane.f32.xlu0 %v397_v62 }
  0x9a   : > { %416 = vadd.xlane.f32.xlu1 %v401_v61 }
  0x9c   : > { %444 = vadd.xlane.f32.xlu0 %v433_v0 }
  0x9e   : > { %452 = vadd.xlane.f32.xlu1 %v437_v63 }
 0x10d   : > { %v403_v16 = vpop.xlane.xlu0 %402 }
 0x10e   : > { %v418_v36 = vmul.f32 0.00390625, %v403_v16 }
 0x10f   : > { %v411_v15 = vpop.xlane.xlu1 %410 }
 0x110   : > { %v422_v35 = vmul.f32 0.00390625, %v411_v15  ;;  %v606_v48 = vrot.slane %v418_v36, %v478_v34 }
 0x111   : > { %v405_v18 = vpop.xlane.xlu0 %404 }
 0x112   : > { %v419_v33 = vmul.f32 0.00390625, %v405_v18  ;;  %v625_v47 = vrot.slane %v422_v35, %v478_v34 }
 0x113   : > { %v413_v17 = vpop.xlane.xlu1 %412 }
 0x114   : > { %v423_v32 = vmul.f32 0.00390625, %v413_v17  ;;  %v610_v44 = vrot.slane %v419_v33, %v483_v31 }
 0x115   : > { %v439_v21 = vpop.xlane.xlu0 %438 }
 0x116   : > { %v629_v43 = vrot.slane %v423_v32, %v483_v31  ;;  %v454_v46 = vmul.f32 0.00390625, %v439_v21  ;;  %v611_v60 = vsel %vm485_vm1, %v610_v44, %v606_v48 }
 0x117   : > { %v441_v20 = vpop.xlane.xlu1 %440 }
 0x118   : > { %v455_v45 = vmul.f32 0.00390625, %v441_v20  ;;  %v630_v59 = vsel %vm485_vm1, %v629_v43, %v625_v47  ;;  %v479_v62 = vrot.slane %v454_v46, %v478_v34 }
 0x119   : > { %v447_v24 = vpop.xlane.xlu0 %446 }
 0x11a   : > { %v458_v50 = vmul.f32 0.00390625, %v447_v24  ;;  %v484_v61 = vrot.slane %v455_v45, %v483_v31  ;;  %v715_v24 = vld [vmem:[%s1768_s4] sm:$0xf] }
 0x11b   : > { %v449_v23 = vpop.xlane.xlu1 %448 }
 0x11c   : > { %v459_v49 = vmul.f32 0.00390625, %v449_v23  ;;  %v504_v0 = vrot.slane %v458_v50, %v478_v34  ;;  %v486_v15 = vsel %vm485_vm1, %v484_v61, %v479_v62 }
 0x11d   : > { %v407_v29 = vpop.xlane.xlu0 %406 }
 0x11e   : > { %v420_v39 = vmul.f32 0.00390625, %v407_v29  ;;  %v508_v63 = vrot.slane %v459_v49, %v483_v31 }
 0x11f   : > { %v415_v28 = vpop.xlane.xlu1 %414 }
 0x120   : > { %v424_v38 = vmul.f32 0.00390625, %v415_v28  ;;  %v615_v52 = vrot.slane %v420_v39, %v490_v37  ;;  %v509_v16 = vsel %vm485_vm1, %v508_v63, %v504_v0 }
 0x121   : > { %v443_v41 = vpop.xlane.xlu0 %442 }
 0x122   : > { %v634_v51 = vrot.slane %v424_v38, %v490_v37  ;;  %v456_v54 = vmul.f32 0.00390625, %v443_v41  ;;  %v616_v4 = vsel %vm492_vm2, %v615_v52, %v611_v60 }
 0x123   : > { %v451_v40 = vpop.xlane.xlu1 %450 }
 0x124   : > { %v460_v53 = vmul.f32 0.00390625, %v451_v40  ;;  %v635_v3 = vsel %vm492_vm2, %v634_v51, %v630_v59  ;;  %v491_v6 = vrot.slane %v456_v54, %v490_v37  ;;  %v1359_v40 = vmov 1966171168  }
 0x125   : > { %v409_v56 = vpop.xlane.xlu0 %408  ;;  %v808_v41 = vunpack.c.l.s4 %v1359_v40 }
 0x126   : > { %v421_v58 = vmul.f32 0.00390625, %v409_v56  ;;  %v513_v5 = vrot.slane %v460_v53, %v490_v37  ;;  %v493_v20 = vsel %vm492_vm2, %v491_v6, %v486_v15 }
 0x127   : > { %v417_v55 = vpop.xlane.xlu1 %416 }
 0x128   : > { %v425_v57 = vmul.f32 0.00390625, %v417_v55  ;;  %v620_v2 = vrot.slane %v421_v58, %v497_v42  ;;  %v514_v19 = vsel %vm492_vm2, %v513_v5, %v509_v16 }
 0x129   : > { %v445_v8 = vpop.xlane.xlu0 %444 }
 0x12a   : > { %v639_v1 = vrot.slane %v425_v57, %v497_v42  ;;  %v457_v10 = vmul.f32 0.00390625, %v445_v8  ;;  %v621_v11 = vsel %vm499_vm3, %v620_v2, %v616_v4 }
 0x12b   : > { %v453_v7 = vpop.xlane.xlu1 %452 }
 0x12c   : > { %v461_v9 = vmul.f32 0.00390625, %v453_v7  ;;  %v640_v12 = vsel %vm499_vm3, %v639_v1, %v635_v3  ;;  %v498_v18 = vrot.slane %v457_v10, %v497_v42 }
 0x12d   : > { %v641_v14 = vsel %vm520_vm4, %v640_v12, %v621_v11 }
 0x12e   : > { %v518_v17 = vrot.slane %v461_v9, %v497_v42  ;;  %1021 = vmatmul.mubr.msk.f32.vlgmr.msra.gmra.mrb[0].mxu0 %vm522_vm5, %v641_v14  ;;  %v500_v21 = vsel %vm499_vm3, %v498_v18, %v493_v20  ;;  %v809_v42 = vunpack.c.0.s8 %v808_v41 }
 0x130   : > { %v519_v22 = vsel %vm499_vm3, %v518_v17, %v514_v19  ;;  %v812_v43 = vsub.s32 %v809_v42, %v1662_v26 }
 0x131   : > { %v521_v23 = vsel %vm520_vm4, %v519_v22, %v500_v21 }
 0x132   : > { %1010 = vmatmul.mubr.msk.f32.vlgmr.msra.gmra.mrb[0].mxu1 %vm522_vm5, %v521_v23 }
 0x133   : > { %1025 = vmatprep.mubr.msk.f32.mxu1 %vm1357_vm0, %v1358_v13  ;;  %1024 = vmatpush3.msk.msra.mxu1 %vm720_vm6, %v715_v24 }
 0x201   : > { %v710_v25 = vpop.f32.mrb[0].mxu0 }
 0x202   : > { %v1022_v27 = vpop.f32.mrb[1].mxu0 }
 0x205   : > { %v591_v28 = vpop.f32.mrb[0].mxu1 }
 0x206   : > { %v711_v29 = vadd.f32 %v710_v25, %v591_v28  ;;  %v1011_v30 = vpop.f32.mrb[1].mxu1 }
 0x208   : > { %v714_v31 = vmax.f32 %v711_v29, 0.0 }
 0x20a   : > { %1026 = vmatmul.mubr.msk.f32.vlgmr.msra.gmra.mrb[2].mxu1 %vm716_vm7, %v714_v31 }
 0x2dd   : > { %v790_v32 = vpop.f32.mrb[2].mxu1 }
 0x2de   : > { %v1027_v33 = vpop.f32.mrb[3].mxu1  ;;  %v795_v34 = vsel %vm794_vm8, %v790_v32, -inf }
 0x2df   : > { %796 = vmax.xlane.f32.xlu0 %v795_v34 }
 0x36c   : > { %v797_v13 = vpop.xlane.xlu0 %796 }
 0x36d   : > { %v798_v35 = vsub.f32 %v790_v32, %v797_v13 }
 0x36f   : > { %v799_v36 = vmul.f32 1.442695, %v798_v35 }
 0x371   : > { %1158 = vpow2.f32 %v799_v36 }
 0x37b   : > { %v1159_v37 = vpop.eup %1158 }
 0x37c   : > { %v801_v38 = vsel %vm794_vm8, %v1159_v37, 0.0 }
 0x37d   : > { %802 = vadd.xlane.f32.xlu1 %v801_v38 }
 0x40a   : > { %v803_v39 = vpop.xlane.xlu1 %802 }
 0x40b   : > { %1160 = vrcp.f32 %v803_v39 }
 0x415   : > { %v1161_v44 = vpop.eup %1160 }
 0x416   : > { %v805_v45 = vmul.f32 %v1161_v44, %v1159_v37 }
 0x418   : > { %v813_v46 = vrot.slane %v805_v45, %v812_v43 }
 0x41a   : > { %v814_v47 = vcombine.high %v813_v46, %v813_v46  ;;  %v821_v48 = vrot.slane %v813_v46, %v812_v43 }
 0x41c   : > { %v828_v49 = vrot.slane %v814_v47, %v812_v43  ;;  %832 = vst.msk [vmem:[%s1613_s9] sm:$0x1] %vm831_vm9, %v821_v48 }
 0x41e   : > { %833 = vst.msk [vmem:[%s1613_s9 + $0x1] sm:$0x1] %vm831_vm9, %v828_v49 }
 0x41f PF: > { %s988_s12 = sshll.u32 %s1336_s25, 5  ;;  %s848_s17 = sshll.u32 %s1613_s9, 4  ;;  %s1699_s17 = int_to_ptr.vmem [resolvable:$true] %s848_s17 }
 0x420   : > { %s1696_s6 = scalar_lea.hbm %s1769_s5, %s988_s12  ;;  %s1703_s23 = scalar_lea.sflag [#allocation6], %s300_s20 }
 0x421   : > { %s1222_s16 = scalar_lea.vmem %s1699_s17, 32  ;;  %p1800_p1 = scmp.ne.s32.totalorder %s1789_s15, 0 }
 0x422   : > { %p1223_p9 = scmp.ne.s32.totalorder %s1699_s17, %s1222_s16  ;;  %s1360_s25 = smov [#allocation9]  }
 0x423   : > { %s1226_s14 = sshll.u32 %s1360_s25, 4  ;;  %s1227_s14 = int_to_ptr.vmem [resolvable:$false] %s1226_s14 }
 0x424   : > { %p1224_p10 = pnand %p1223_p9, %p1800_p1  ;;  %s1228_s0 = scalar_lea.vmem %s1227_s14, 64 }
 0x425   : > { %p1229_p12 = scmp.lt.s32.totalorder %s1699_s17, %s1227_s14  ;;  %p1230_p2 = scmp.lt.s32.totalorder %s1228_s0, %s1222_s16 }
 0x426   : > { %p1225_p11 = pneg %p1224_p10 }
 0x427   : > { %p1231_p13 = por %p1230_p2, %p1229_p12 }
 0x429   : > { %p1232_p0 = pnand %p1231_p13, %p1225_p11 }
 0x42b   : > { %1235 = shalt.err (!%p1232_p0)
}
 0x42c   : > { %s1236_s20 = scalar_lea.hbm %s1696_s6, 32  ;;  %s1240_s8 = scalar_lea.hbm %s1769_s5, 64 }
 0x42d   : > { %p1237_p5 = scmp.ne.s32.totalorder %s1696_s6, %s1236_s20  ;;  %p1241_p7 = scmp.lt.u32.totalorder %s1696_s6, %s1769_s5 }
 0x42e   : > { %p1242_p4 = scmp.lt.u32.totalorder %s1240_s8, %s1236_s20  ;;  %p1244_p9 = scmp.lt.u32.totalorder %s1236_s20, %s1696_s6 }
 0x42f   : > { %p1238_p8 = pnand %p1237_p5, %p1800_p1 }
 0x430   : > { %p1243_p6 = por %p1242_p4, %p1241_p7 }
 0x431   : > { %p1239_p3 = pneg %p1238_p8 }
 0x432   : > { %p1245_p10 = por %p1244_p9, %p1243_p6 }
 0x434   : > { %p1246_p11 = pnand %p1245_p10, %p1239_p3 }
 0x436   : > { %1249 = shalt.err (!%p1246_p11)
}
 0x437   : > { %s1361_s29 = smov 16   ;;  %s1362_s13 = smov 1  }
 0x438   : > { %1045 = dma.vmem_to_hbm [thread:$0]  (%p1800_p1), %s1699_s17, 32, %s1696_s6, %s1703_s23, %s1361_s29, %s1361_s29, %s1362_s13  }
 0x439 PF: > { %p1059_p12 = scmp.ge.s32.totalorder %s1348_s28, 2  ;;  %s863_s26 = sand.u32 1, %s1308_s18  }
 0x43a   : > { %p1801_p2 = scmp.ne.s32.totalorder %s1792_s21, 0  ;;  %s864_s24 = scalar_lea.sflag [#allocation6], %s863_s26 }
 0x43c   : > { %p1055_p13 = pnand %p1059_p12, %p1801_p2 }
 0x43e   : > { %1303 = dma.done.wait (!%p1055_p13), %s864_s24, 32  }
 0x43f   : > { %1305 = vsyncadd (!%p1055_p13), %s864_s24, 4294967264  ;;  %s24_s28 = sadd.s32 1, %s1348_s28   ;;  %s1802_s12 = sld [smem:[#allocation13_spill]] }
 0x440   : > { %p21_p0 = scmp.ge.s32.totalorder %s24_s28, 6   ;;  %s1803_s20 = sld [smem:[#allocation19_spill]] }
 0x441   : > { %s1804_s15 = sld [smem:[#allocation14_spill]]  ;;  %s1805_s23 = sld [smem:[#allocation20_spill]] }
 0x442   : > { %s1806_s24 = sld [smem:[#allocation15_spill]]  ;;  %s1807_s25 = sld [smem:[#allocation16_spill]] }
 0x443   : > { %s1808_s26 = sld [smem:[#allocation17_spill]]  ;;  %s1809_s27 = sld [smem:[#allocation18_spill]] }
 0x444   : > { %s1810_s18 = smov %s1312_s19  ;;  %s1812_s21 = smov %s1324_s22 }
 0x445   : > { %s1811_s19 = smov %s1802_s12  ;;  %23 = sbr.rel (!%p21_p0) target bundleno = 13 (0xd), region = 106 }
 0x447   : > { %s1813_s22 = smov %s1804_s15 }
 0x44c   :  { %869 = vsyncpa [#allocation5], 1 }
 0x44d   :  { %871 = vsyncpa [#allocation5 + $0x1], 1 }
 0x44e   :  { %872 = vsyncpa [#allocation8], 1 }
 0x44f   :  { %874 = vsyncpa [#allocation8 + $0x1], 1 }
 0x450   :  { %875 = vsyncpa [#allocation6], 1 }
 0x451   :  { %877 = vsyncpa [#allocation6 + $0x1], 1 }

</bundles_post_ra>
